<compile_context>
chip_gen: v7x
topology: tpu7x:2x2x1
jax: 0.10.0
libtpu: 0.0.40
codegen_flags: <defaults>
</compile_context>

<pallas_src>
import functools
import math

import numpy as np
import jax
import jax.numpy as jnp
from jax.experimental import pallas as pl
from jax.experimental.pallas import tpu as pltpu

_HIDDEN = 32
_EPS = 1e-5


def _sublane_multiple(*dtypes):
    """Second-to-last block-dim multiple required for these dtypes."""
    m = 8
    for dt in dtypes:
        m = max(m, 8 * (4 // jnp.dtype(dt).itemsize))
    return m


def _padded_bytes(shape, dtype):
    """VMEM footprint of one buffer of `shape` (lane dim -> 128, sublane dim
    -> native tile for the dtype)."""
    itemsize = jnp.dtype(dtype).itemsize
    sub = 8 * (4 // itemsize)
    r = shape[-2] if len(shape) >= 2 else 1
    c = shape[-1]
    lead = 1
    for d in shape[:-2]:
        lead *= int(d)
    rp = (r + sub - 1) // sub * sub
    cp = (c + 127) // 128 * 128
    return lead * rp * cp * itemsize


def _vmem_budget():
    """Per-chip VMEM budget (~3/4 of physical); conservative (v7x) fallback."""
    try:
        cap = int(pltpu.get_tpu_info().vmem_capacity_bytes)
    except Exception:
        cap = 64 << 20
    return max(16 << 20, (cap // 4) * 3)


# ---------------------------------------------------------------------------
# Kernel A: h = x @ W1p + b1 (pool folded into W1p) + per-tile BN partials.
# Grid over N, fully "parallel" (no cross-iteration state).
# ---------------------------------------------------------------------------
def _dense1_stats_kernel(x_ref, w1_ref, b1_ref, h_ref, sum_ref, sq_ref,
                         *, n_true, block_n):
    i = pl.program_id(0)

    # One lane-dense MXU matmul (pool already folded into W1p), f32 accum.
    h = jnp.dot(x_ref[...], w1_ref[...],
                preferred_element_type=jnp.float32) + b1_ref[...]
    h_ref[...] = h.astype(h_ref.dtype)

    last = pl.num_programs(0) - 1

    @pl.when(i != last)
    def _():  # full tile: no masking filler
        sum_ref[...] = jnp.sum(h, axis=0, keepdims=True).reshape(1, 1, _HIDDEN)
        sq_ref[...] = jnp.sum(h * h, axis=0, keepdims=True).reshape(1, 1, _HIDDEN)

    @pl.when(i == last)
    def _():  # ragged tail: exclude out-of-bounds rows from the BN statistics
        row = i * block_n + jax.lax.broadcasted_iota(jnp.int32, (block_n, 1), 0)
        hm = jnp.where(row < n_true, h, 0.0)
        sum_ref[...] = jnp.sum(hm, axis=0, keepdims=True).reshape(1, 1, _HIDDEN)
        sq_ref[...] = jnp.sum(hm * hm, axis=0, keepdims=True).reshape(1, 1, _HIDDEN)


# ---------------------------------------------------------------------------
# Kernel B: reduce BN partials -> BatchNorm + ReLU + Linear(32,n_out) + sigmoid.
# Grid over N ("parallel"); large blocks, narrow (N, n_out) output.
# ---------------------------------------------------------------------------
def _bn_dense2_kernel(h_ref, psum_ref, psq_ref, gamma_ref, beta_ref,
                      w2_ref, b2_ref, o_ref, *, inv_n):
    mu = jnp.sum(psum_ref[...], axis=0) * inv_n                       # (1, 32)
    var = jnp.maximum(jnp.sum(psq_ref[...], axis=0) * inv_n - mu * mu, 0.0)
    scale = gamma_ref[...] * jax.lax.rsqrt(var + _EPS)
    shift = beta_ref[...] - mu * scale
    z = jnp.maximum(h_ref[...].astype(jnp.float32) * scale + shift, 0.0)
    logits = jnp.dot(z, w2_ref[...],
                     preferred_element_type=jnp.float32) + b2_ref[...]
    o_ref[...] = jax.nn.sigmoid(logits)


def isup_predictor_forward(x_ncl, params, *, block_n=None, block_b=None,
                           h_dtype=jnp.float32):
    """Forward pass of ISUPPredictor.

    x_ncl: (N, C, L), C == 1 (the module's flatten/Linear only line up for
    C == 1). x is streamed in its own dtype -- no pad/cast copy is made.
    h_dtype: dtype of the (N, 32) hidden round trip (bf16 halves its traffic).
    """
    w1, b1, gamma, beta, w2, b2 = params
    n, c, l = x_ncl.shape
    p = w1.shape[0]
    assert c == 1, "original module only lines up for C == 1"
    n_out = w2.shape[1]

    # Lane-dense (N, L) view: metadata-only reshape, no HBM copy / pad / cast.
    x = x_ncl.reshape(n, l)
    x_dt = x.dtype
    x_bytes = jnp.dtype(x_dt).itemsize
    h_bytes = jnp.dtype(h_dtype).itemsize

    # Fold AdaptiveAvgPool1d(P) into the first Linear (PyTorch window rule:
    # start = floor(i*L/P), end = ceil((i+1)*L/P)); tiny one-off host build.
    starts = (np.arange(p) * l) // p
    ends = ((np.arange(p) + 1) * l + p - 1) // p
    pool = np.zeros((l, p), np.float32)
    for i in range(p):
        pool[starts[i]:ends[i], i] = 1.0 / float(ends[i] - starts[i])
    # Cast W1p to x's dtype so a bf16 x gets the bf16 MXU path end to end.
    w1p = (jnp.asarray(pool) @ w1.astype(jnp.float32)).astype(x_dt)   # (L, 32)

    b1 = b1.reshape(1, _HIDDEN).astype(jnp.float32)
    gamma = gamma.reshape(1, _HIDDEN).astype(jnp.float32)
    beta = beta.reshape(1, _HIDDEN).astype(jnp.float32)
    w2 = w2.astype(jnp.float32)                        # (32, n_out), narrow out
    b2 = b2.reshape(1, n_out).astype(jnp.float32)

    budget = _vmem_budget()

    # ---- Kernel A tiling: ~4 MiB x tiles, shrink block_n (not the limit) to
    # fit the per-chip VMEM budget. Constant-index weights are still
    # double-buffered by the pipeline, so they are counted twice here.
    align_a = _sublane_multiple(x_dt, h_dtype)

    def _vmem_need_a(bn):
        return (2 * (_padded_bytes((bn, l), x_dt)
                     + _padded_bytes((bn, _HIDDEN), h_dtype))
                + 2 * _padded_bytes((l, _HIDDEN), x_dt)
                + 2 * _padded_bytes((1, _HIDDEN), jnp.float32)
                + 4 * _padded_bytes((1, 1, _HIDDEN), jnp.float32)
                + (1 << 20))

    if block_n is None:
        tgt = max(align_a, min(8192, (4 << 20) // max(1, l * x_bytes)))
        tgt = max(align_a, tgt // align_a * align_a)
        while tgt > align_a and _vmem_need_a(tgt) > budget:
            tgt = max(align_a, (tgt // 2) // align_a * align_a)
        block_n = tgt
    else:
        block_n = max(align_a, int(block_n) // align_a * align_a)
    block_n = n if n <= block_n else block_n
    grid_a = pl.cdiv(n, block_n)
    vmem_a = int(min(budget, max(_vmem_need_a(block_n), 16 << 20)))

    h, hsum, hsq = pl.pallas_call(
        functools.partial(_dense1_stats_kernel, n_true=n, block_n=block_n),
        grid=(grid_a,),
        in_specs=[
            pl.BlockSpec((block_n, l), lambda i: (i, 0)),
            pl.BlockSpec((l, _HIDDEN), lambda i: (0, 0)),     # VMEM-resident
            pl.BlockSpec((1, _HIDDEN), lambda i: (0, 0)),
        ],
        out_specs=(
            pl.BlockSpec((block_n, _HIDDEN), lambda i: (i, 0)),
            pl.BlockSpec((1, 1, _HIDDEN), lambda i: (i, 0, 0)),
            pl.BlockSpec((1, 1, _HIDDEN), lambda i: (i, 0, 0)),
        ),
        out_shape=(
            jax.ShapeDtypeStruct((n, _HIDDEN), h_dtype),
            jax.ShapeDtypeStruct((grid_a, 1, _HIDDEN), jnp.float32),
            jax.ShapeDtypeStruct((grid_a, 1, _HIDDEN), jnp.float32),
        ),
        compiler_params=pltpu.CompilerParams(
            dimension_semantics=("parallel",),          # both v7x TCs usable
            vmem_limit_bytes=vmem_a),
        cost_estimate=pl.CostEstimate(
            flops=2 * n * l * _HIDDEN,
            transcendentals=0,
            bytes_accessed=n * l * x_bytes + l * _HIDDEN * x_bytes
                           + n * _HIDDEN * h_bytes + 2 * grid_a * _HIDDEN * 4),
    )(x, w1p, b1)

    # ---- Kernel B tiling: decoupled from Kernel A, large blocks, narrow out.
    align_b = _sublane_multiple(h_dtype)

    def _vmem_need_b(bb):
        return (2 * (_padded_bytes((bb, _HIDDEN), h_dtype)
                     + _padded_bytes((bb, n_out), jnp.float32))
                + 4 * _padded_bytes((grid_a, 1, _HIDDEN), jnp.float32)
                + 4 * _padded_bytes((1, _HIDDEN), jnp.float32)
                + 2 * _padded_bytes((_HIDDEN, n_out), jnp.float32)
                + 2 * _padded_bytes((1, n_out), jnp.float32)
                + (1 << 20))

    if block_b is None:
        bb = 8192
        while bb > align_b and _vmem_need_b(bb) > budget:
            bb = max(align_b, (bb // 2) // align_b * align_b)
        block_b = bb
    else:
        block_b = max(align_b, int(block_b) // align_b * align_b)
    block_b = n if n <= block_b else block_b
    grid_b = pl.cdiv(n, block_b)
    vmem_b = int(min(budget, max(_vmem_need_b(block_b), 16 << 20)))

    out = pl.pallas_call(
        functools.partial(_bn_dense2_kernel, inv_n=1.0 / n),
        grid=(grid_b,),
        in_specs=[
            pl.BlockSpec((block_b, _HIDDEN), lambda i: (i, 0)),
            pl.BlockSpec((grid_a, 1, _HIDDEN), lambda i: (0, 0, 0)),
            pl.BlockSpec((grid_a, 1, _HIDDEN), lambda i: (0, 0, 0)),
            pl.BlockSpec((1, _HIDDEN), lambda i: (0, 0)),
            pl.BlockSpec((1, _HIDDEN), lambda i: (0, 0)),
            pl.BlockSpec((_HIDDEN, n_out), lambda i: (0, 0)),
            pl.BlockSpec((1, n_out), lambda i: (0, 0)),
        ],
        out_specs=pl.BlockSpec((block_b, n_out), lambda i: (i, 0)),
        out_shape=jax.ShapeDtypeStruct((n, n_out), jnp.float32),
        compiler_params=pltpu.CompilerParams(
            dimension_semantics=("parallel",),
            vmem_limit_bytes=vmem_b),
        cost_estimate=pl.CostEstimate(
            flops=2 * n * _HIDDEN * n_out + 8 * n * _HIDDEN,
            transcendentals=n * n_out,
            bytes_accessed=n * _HIDDEN * h_bytes + n * n_out * 4
                           + 2 * grid_a * _HIDDEN * 4 + _HIDDEN * n_out * 4),
    )(h, hsum, hsq, gamma, beta, w2, b2)

    return out


def init_params(input_channels, n_classes=6, hidden=_HIDDEN, seed=0):
    """Deterministic init mimicking fresh PyTorch layers (uniform +-1/sqrt(fan_in),
    BatchNorm gamma=1 / beta=0)."""
    key = jax.random.PRNGKey(seed)
    k1, k2, k3, k4 = jax.random.split(key, 4)
    bnd1 = 1.0 / math.sqrt(input_channels)
    w1 = jax.random.uniform(k1, (input_channels, hidden), jnp.float32, -bnd1, bnd1)
    b1 = jax.random.uniform(k2, (1, hidden), jnp.float32, -bnd1, bnd1)
    gamma = jnp.ones((1, hidden), jnp.float32)
    beta = jnp.zeros((1, hidden), jnp.float32)
    bnd2 = 1.0 / math.sqrt(hidden)
    w2 = jax.random.uniform(k3, (hidden, n_classes - 1), jnp.float32, -bnd2, bnd2)
    b2 = jax.random.uniform(k4, (1, n_classes - 1), jnp.float32, -bnd2, bnd2)
    return (w1, b1, gamma, beta, w2, b2)


def _reference_forward(x_ncl, params):
    """Pure-JAX reference with identical semantics (PyTorch adaptive-pool
    windows, training-mode BatchNorm)."""
    w1, b1, gamma, beta, w2, b2 = params
    n, c, l = x_ncl.shape
    p = w1.shape[0]
    x = x_ncl.reshape(n, l).astype(jnp.float32)
    cols = []
    for i in range(p):
        s = (i * l) // p
        e = ((i + 1) * l + p - 1) // p
        cols.append(x[:, s:e].mean(axis=1))
    pooled = jnp.stack(cols, axis=1)
    h = pooled @ w1 + b1
    mu = h.mean(0, keepdims=True)
    var = ((h - mu) ** 2).mean(0, keepdims=True)
    h = jnp.maximum((h - mu) / jnp.sqrt(var + _EPS) * gamma + beta, 0.0)
    return jax.nn.sigmoid(h @ w2 + b2)


if __name__ == "__main__":
    input_channels = 8       # P: AdaptiveAvgPool1d output size == Linear fan-in
    n_classes = 6
    batch, chan, length = 20, 1, 64   # NCL input

    params = init_params(input_channels, n_classes)
    x = jax.random.normal(jax.random.PRNGKey(0), (batch, chan, length),
                          jnp.float32)
    ref = _reference_forward(x, params)

    # f32, forced small block_n -> multi-tile grid with a ragged last tile
    # (20 = 16 + 4): exercises the per-tile BN partials + last-tile masking.
    out = jax.block_until_ready(isup_predictor_forward(x, params, block_n=16))
    assert out.shape == (batch, n_classes - 1)
    assert jnp.allclose(out, ref, atol=1e-4, rtol=1e-4), "f32 (tiled) mismatch"

    # Default tiling (single tile at this size).
    out_d = jax.block_until_ready(isup_predictor_forward(x, params))
    assert jnp.allclose(out_d, ref, atol=1e-4, rtol=1e-4), "f32 (default) mismatch"

    # bf16-upstream x + bf16 hidden round trip (bandwidth lever on all chips;
    # MXU still accumulates in f32).
    out_bf = jax.block_until_ready(
        isup_predictor_forward(x.astype(jnp.bfloat16), params, block_n=16,
                               h_dtype=jnp.bfloat16))
    assert out_bf.shape == (batch, n_classes - 1)
    assert jnp.allclose(out_bf, ref, atol=5e-2, rtol=5e-2), "bf16 mismatch"

    # L not divisible by P: general adaptive-pool fold.
    x2 = jax.random.normal(jax.random.PRNGKey(1), (batch, chan, 70), jnp.float32)
    ref2 = _reference_forward(x2, params)
    out2 = jax.block_until_ready(isup_predictor_forward(x2, params))
    assert jnp.allclose(out2, ref2, atol=1e-4, rtol=1e-4), "ragged-L mismatch"

    print("KERNEL_OK")
</pallas_src>

<mosaic_0001>
module attributes {stable_mosaic.version = 11 : i64} {
  func.func @_dense1_stats_kernel(%arg0: i32, %arg1: memref<16x64xf32, #tpu.memory_space<vmem>>, %arg2: memref<64x32xf32, #tpu.memory_space<vmem>>, %arg3: memref<1x32xf32, #tpu.memory_space<vmem>>, %arg4: memref<16x32xf32, #tpu.memory_space<vmem>>, %arg5: memref<1x1x32xf32, #tpu.memory_space<vmem>>, %arg6: memref<1x1x32xf32, #tpu.memory_space<vmem>>) attributes {dimension_semantics = [#tpu.dimension_semantics<parallel>], iteration_bounds = array<i64: 2>, scalar_prefetch = 0 : i64, scratch_operands = 0 : i64, tpu.core_type = #tpu.core_type<tc>, window_params = [{transform_indices = @transform_0, window_bounds = array<i64: 16, 64>}, {pipeline_mode = #tpu.pipeline_mode<synchronous>, transform_indices = @transform_1, window_bounds = array<i64: 64, 32>}, {pipeline_mode = #tpu.pipeline_mode<synchronous>, transform_indices = @transform_2, window_bounds = array<i64: 1, 32>}, {transform_indices = @transform_3, window_bounds = array<i64: 16, 32>}, {transform_indices = @transform_4, window_bounds = array<i64: 1, 1, 32>}, {transform_indices = @transform_5, window_bounds = array<i64: 1, 1, 32>}]} {
    %c0 = arith.constant 0 : index
    %c0_0 = arith.constant 0 : index
    %0 = vector.load %arg1[%c0, %c0_0] : memref<16x64xf32, #tpu.memory_space<vmem>>, vector<16x64xf32>
    %c0_1 = arith.constant 0 : index
    %c0_2 = arith.constant 0 : index
    %1 = vector.load %arg2[%c0_1, %c0_2] : memref<64x32xf32, #tpu.memory_space<vmem>>, vector<64x32xf32>
    %cst = arith.constant dense<0.000000e+00> : vector<16x32xf32>
    %2 = tpu.matmul %0, %1, %cst {dimension_numbers = #tpu.dot_dimension_numbers<[1], [0], [0], [1], [0, 0, 1, 1], [], []>} : vector<16x64xf32>, vector<64x32xf32>, vector<16x32xf32> -> vector<16x32xf32>
    %c0_3 = arith.constant 0 : index
    %c0_4 = arith.constant 0 : index
    %3 = vector.load %arg3[%c0_3, %c0_4] : memref<1x32xf32, #tpu.memory_space<vmem>>, vector<1x32xf32>
    %4 = vector.broadcast %3 : vector<1x32xf32> to vector<16x32xf32>
    %5 = arith.addf %2, %4 : vector<16x32xf32>
    %c0_5 = arith.constant 0 : index
    %c0_6 = arith.constant 0 : index
    %6 = vector.load %arg4[%c0_5, %c0_6] : memref<16x32xf32, #tpu.memory_space<vmem>>, vector<16x32xf32>
    tpu.vector_store %arg4[%c0_5, %c0_6], %5 {strides = array<i32>} : memref<16x32xf32, #tpu.memory_space<vmem>>, vector<16x32xf32>,
    %c1_i32 = arith.constant 1 : i32
    %7 = arith.cmpi ne, %arg0, %c1_i32 : i32
    %8 = arith.extui %7 : i1 to i32
    %c0_i32 = arith.constant 0 : i32
    %9 = arith.cmpi ne, %8, %c0_i32 : i32
    scf.if %9 {
      %cst_9 = arith.constant dense<0.000000e+00> : vector<32xf32>
      %13 = vector.multi_reduction <add>, %5, %cst_9 [0] : vector<16x32xf32> to vector<32xf32>
      %14 = vector.shape_cast %13 : vector<32xf32> to vector<1x32xf32>
      %15 = vector.shape_cast %14 : vector<1x32xf32> to vector<1x1x32xf32>
      %c0_10 = arith.constant 0 : index
      %c0_11 = arith.constant 0 : index
      %c0_12 = arith.constant 0 : index
      %16 = vector.load %arg5[%c0_10, %c0_11, %c0_12] : memref<1x1x32xf32, #tpu.memory_space<vmem>>, vector<1x1x32xf32>
      tpu.vector_store %arg5[%c0_10, %c0_11, %c0_12], %15 {strides = array<i32>} : memref<1x1x32xf32, #tpu.memory_space<vmem>>, vector<1x1x32xf32>,
      %17 = arith.mulf %5, %5 : vector<16x32xf32>
      %cst_13 = arith.constant dense<0.000000e+00> : vector<32xf32>
      %18 = vector.multi_reduction <add>, %17, %cst_13 [0] : vector<16x32xf32> to vector<32xf32>
      %19 = vector.shape_cast %18 : vector<32xf32> to vector<1x32xf32>
      %20 = vector.shape_cast %19 : vector<1x32xf32> to vector<1x1x32xf32>
      %c0_14 = arith.constant 0 : index
      %c0_15 = arith.constant 0 : index
      %c0_16 = arith.constant 0 : index
      %21 = vector.load %arg6[%c0_14, %c0_15, %c0_16] : memref<1x1x32xf32, #tpu.memory_space<vmem>>, vector<1x1x32xf32>
      tpu.vector_store %arg6[%c0_14, %c0_15, %c0_16], %20 {strides = array<i32>} : memref<1x1x32xf32, #tpu.memory_space<vmem>>, vector<1x1x32xf32>,
    } else {
    }
    %c1_i32_7 = arith.constant 1 : i32
    %10 = arith.cmpi eq, %arg0, %c1_i32_7 : i32
    %11 = arith.extui %10 : i1 to i32
    %c0_i32_8 = arith.constant 0 : i32
    %12 = arith.cmpi ne, %11, %c0_i32_8 : i32
    scf.if %12 {
      %c16_i32 = arith.constant 16 : i32
      %13 = arith.muli %arg0, %c16_i32 : i32
      %14 = tpu.iota {dimensions = array<i32: 0>} : vector<16x1xi32>
      %15 = vector.broadcast %13 : i32 to vector<16x1xi32>
      %16 = arith.addi %15, %14 : vector<16x1xi32>
      %c20_i32 = arith.constant 20 : i32
      %17 = vector.broadcast %c20_i32 : i32 to vector<16x1xi32>
      %18 = arith.cmpi slt, %16, %17 : vector<16x1xi32>
      %cst_9 = arith.constant 0.000000e+00 : f32
      %19 = vector.shape_cast %18 : vector<16x1xi1> to vector<16x1xi1>
      %20 = vector.broadcast %19 : vector<16x1xi1> to vector<16x32xi1>
      %21 = vector.broadcast %cst_9 : f32 to vector<16x32xf32>
      %22 = arith.select %20, %5, %21 : vector<16x32xi1>, vector<16x32xf32>
      %cst_10 = arith.constant dense<0.000000e+00> : vector<32xf32>
      %23 = vector.multi_reduction <add>, %22, %cst_10 [0] : vector<16x32xf32> to vector<32xf32>
      %24 = vector.shape_cast %23 : vector<32xf32> to vector<1x32xf32>
      %25 = vector.shape_cast %24 : vector<1x32xf32> to vector<1x1x32xf32>
      %c0_11 = arith.constant 0 : index
      %c0_12 = arith.constant 0 : index
      %c0_13 = arith.constant 0 : index
      %26 = vector.load %arg5[%c0_11, %c0_12, %c0_13] : memref<1x1x32xf32, #tpu.memory_space<vmem>>, vector<1x1x32xf32>
      tpu.vector_store %arg5[%c0_11, %c0_12, %c0_13], %25 {strides = array<i32>} : memref<1x1x32xf32, #tpu.memory_space<vmem>>, vector<1x1x32xf32>,
      %27 = arith.mulf %22, %22 : vector<16x32xf32>
      %cst_14 = arith.constant dense<0.000000e+00> : vector<32xf32>
      %28 = vector.multi_reduction <add>, %27, %cst_14 [0] : vector<16x32xf32> to vector<32xf32>
      %29 = vector.shape_cast %28 : vector<32xf32> to vector<1x32xf32>
      %30 = vector.shape_cast %29 : vector<1x32xf32> to vector<1x1x32xf32>
      %c0_15 = arith.constant 0 : index
      %c0_16 = arith.constant 0 : index
      %c0_17 = arith.constant 0 : index
      %31 = vector.load %arg6[%c0_15, %c0_16, %c0_17] : memref<1x1x32xf32, #tpu.memory_space<vmem>>, vector<1x1x32xf32>
      tpu.vector_store %arg6[%c0_15, %c0_16, %c0_17], %30 {strides = array<i32>} : memref<1x1x32xf32, #tpu.memory_space<vmem>>, vector<1x1x32xf32>,
    } else {
    }
    return
  }
  func.func @transform_0(%arg0: i32) -> (i32, i32) {
    %c0_i32 = arith.constant 0 : i32
    %c0_i32_0 = arith.constant 0 : i32
    return %arg0, %c0_i32 : i32, i32
  }
  func.func @transform_1(%arg0: i32) -> (i32, i32) {
    %c0_i32 = arith.constant 0 : i32
    %c0_i32_0 = arith.constant 0 : i32
    %c0_i32_1 = arith.constant 0 : i32
    return %c0_i32, %c0_i32_0 : i32, i32
  }
  func.func @transform_2(%arg0: i32) -> (i32, i32) {
    %c0_i32 = arith.constant 0 : i32
    %c0_i32_0 = arith.constant 0 : i32
    %c0_i32_1 = arith.constant 0 : i32
    return %c0_i32, %c0_i32_0 : i32, i32
  }
  func.func @transform_3(%arg0: i32) -> (i32, i32) {
    %c0_i32 = arith.constant 0 : i32
    %c0_i32_0 = arith.constant 0 : i32
    return %arg0, %c0_i32 : i32, i32
  }
  func.func @transform_4(%arg0: i32) -> (i32, i32, i32) {
    %c0_i32 = arith.constant 0 : i32
    %c0_i32_0 = arith.constant 0 : i32
    %c0_i32_1 = arith.constant 0 : i32
    return %arg0, %c0_i32, %c0_i32_0 : i32, i32, i32
  }
  func.func @transform_5(%arg0: i32) -> (i32, i32, i32) {
    %c0_i32 = arith.constant 0 : i32
    %c0_i32_0 = arith.constant 0 : i32
    %c0_i32_1 = arith.constant 0 : i32
    return %arg0, %c0_i32, %c0_i32_0 : i32, i32, i32
  }
}

</mosaic_0001>

<bundles_post_ra>
// kernel: tpu_custom_call.1
= control target key start
LH: loop header
LB: loop body
LE: loop exit
PB: predicated region body
PF: predicated region fallthrough
CT: control target
= control target key end

     0   :  { %11 = vsyncpa [#allocation3], 0  ;;  %s1117_s0 = inlined_call_operand.vmem [shape: f32[20,64], index: 0, kind: input, shape index: {}]   ;;  %s1118_s1 = inlined_call_operand.vmem [shape: f32[64,32], index: 1, kind: input, shape index: {}]   ;;  %s1119_s2 = inlined_call_operand.vmem [shape: f32[1,32], index: 2, kind: input, shape index: {}]   ;;  %s1120_s3 = inlined_call_operand.hbm [shape: f32[20,32], index: 3, kind: output, shape index: {0}]   ;;  %s1121_s4 = inlined_call_operand.hbm [shape: f32[2,1,32], index: 4, kind: output, shape index: {1}]   ;;  %s1122_s5 = inlined_call_operand.hbm [shape: f32[2,1,32], index: 5, kind: output, shape index: {2}]  }
   0x1   :  { %13 = vsyncpa [#allocation3 + $0x1], 0 }
   0x2   :  { %14 = vsyncpa [#allocation5], 0 }
   0x3   :  { %16 = vsyncpa [#allocation5 + $0x1], 0  ;;  %s885_s18 = smov 0   ;;  %s887_s19 = smov 0  }
   0x4   :  { %s889_s20 = smov 0   ;;  %s891_s21 = smov 0  }
   0x5 LB: > { %s906_s22 = sadd.s32 4294967295, %s848_s21   ;;  %s1123_s23 = sadd.s32 4294967294, %s848_s21   ;;  %s848_s21 = sphi %s891_s21, %s1130_s21   ;;  %s844_s20 = sphi %s889_s20, %s1129_s20   ;;  %s840_s19 = sphi %s887_s19, %s1128_s19   ;;  %s836_s18 = sphi %s885_s18, %s1127_s18  }
   0x6   : > { %s910_s24 = sadd.s32 1, %s848_s21   ;;  %s97_s25 = sadd.s32 1, %s844_s20 }
   0x7   : > { %s94_s26 = ssub.s32 %s848_s21, %s910_s24  ;;  %p107_p0 = scmp.ne.s32.totalorder %s844_s20, %s840_s19 }
   0x8   : > { %p95_p1 = scmp.eq.s32.totalorder %s94_s26, 0  ;;  %p108_p2 = scmp.eq.s32.totalorder %s906_s22, 1 }
   0x9   : > { %p113_p3 = scmp.ne.s32.totalorder %s840_s19, %s836_s18  ;;  %p114_p4 = scmp.eq.s32.totalorder %s1123_s23, 1 }
   0xa   : > { %s923_s27 = scalar_select %p95_p1, %s844_s20, %s97_s25  }
   0xb   : > { %p927_p5 = por %p108_p2, %p107_p0  ;;  %p931_p6 = por %p114_p4, %p113_p3 }
   0xc   : > { %p609_p7 = scmp.ge.s32.totalorder %s848_s21, 1  ;;  %p207_p8 = scmp.lt.s32.totalorder %s848_s21, 3 }
   0xe   : > { %p208_p9 = pnand %p609_p7, %p207_p8 }
   0xf   : > { %v268_v0 = vld [vmem:[%s1118_s1] sm:$0xff] (!%p208_p9)  ;;  %v269_v1 = vld [vmem:[%s1118_s1 + $0x8] sm:$0xff] (!%p208_p9)  ;;  %v270_v2 = vld [vmem:[%s1118_s1 + $0x10] sm:$0xff] (!%p208_p9)  ;;  %s947_s11 = sshll.u32 (!%p208_p9), %s906_s22, 1  ;;  %s954_s14 = sand.u32 (!%p208_p9), 1, %s840_s19   ;;  %vm283_vm0 = vcmask (!%p208_p9), 523264  }
  0x10   : > { %211 = sbr.rel (%p208_p9) target bundleno = 379 (0x17b), region = 32  ;;  %v660_v3 = vpack.c.bf16 (!%p208_p9), %v269_v1, %v268_v0  ;;  %v271_v4 = vld [vmem:[%s1118_s1 + $0x18] sm:$0xff] (!%p208_p9)  ;;  %p252_p10 = scmp.lt.s32.totalorder (!%p208_p9), %s947_s11, 2  ;;  %v272_v6 = vld [vmem:[%s1118_s1 + $0x20] sm:$0xff] (!%p208_p9)  ;;  %v273_v7 = vld [vmem:[%s1118_s1 + $0x28] sm:$0xff] (!%p208_p9)  ;;  %vm365_vm1 = vcmask (!%p208_p9), 261120  }
  0x11   : > { %v664_v5 = vpack.c.bf16 (!%p208_p9), %v271_v4, %v270_v2  ;;  %v668_v8 = vpack.c.bf16 (!%p208_p9), %v273_v7, %v272_v6  ;;  %v274_v9 = vld [vmem:[%s1118_s1 + $0x30] sm:$0xff] (!%p208_p9)  ;;  %v275_v10 = vld [vmem:[%s1118_s1 + $0x38] sm:$0xff] (!%p208_p9)  ;;  %s610_s15 = sshll.u32 (!%p208_p9), %s954_s14, 4  ;;  %v613_v14 = vld [vmem:[%s1119_s2] ss:$0 sm:$0xff] (!%p208_p9) }
  0x12   : > { %661 = vmatprep.subr.bf16.mxu0 (!%p208_p9), %v660_v3  ;;  %v672_v12 = vpack.c.bf16 (!%p208_p9), %v275_v10, %v274_v9  ;;  %s976_s25 = scalar_lea.vmem (!%p208_p9), [#allocation2], %s610_s15 }
  0x13   : > { %663 = vmatpush3.bf16.msra.mxu0 (!%p208_p9), %v660_v3 }
  0x14   : > { %665 = vmatprep.subr.bf16.mxu0 (!%p208_p9), %v664_v5 }
  0x17   : > { %s253_s26 = scalar_select %p252_p10, %s947_s11, 2  ;;  %667 = vmatpush3.bf16.msra.mxu0 %v664_v5 }
  0x18   : > { %669 = vmatprep.subr.bf16.mxu0 %v668_v8  ;;  %vm381_vm2 = vcmask (!%p108_p2), 253952  }
  0x19   : > { %s612_s30 = sshll.u32 %s253_s26, 3  ;;  %s983_s26 = scalar_lea.vmem [#allocation4], %s954_s14 }
  0x1a   : > { %s255_s13 = scalar_lea.vmem %s1117_s0, %s612_s30  ;;  %s986_s30 = scalar_lea.vmem [#allocation6], %s954_s14 }
  0x1b   : > { %v266_v11 = vld [vmem:[%s255_s13] sm:$0xff]  ;;  %671 = vmatpush3.bf16.msra.mxu0 %v668_v8  ;;  %v267_v13 = vld [vmem:[%s255_s13 + $0x8] sm:$0xff] }
  0x1c   : > { %657 = vmatprep.mubr.msk.f32.mxu0 %vm283_vm0, %v266_v11  ;;  %673 = vmatprep.subr.bf16.mxu0 %v672_v12 }
  0x1f   : > { %675 = vmatpush3.bf16.msra.mxu0 %v672_v12 }
  0x22   : > { %658 = vmatmul.mubr.msk.f32.vlgmr.msra.gmra.mrb[0].mxu0 %vm283_vm0, %v267_v13 }
  0xf3   : > { %371 = sbr.rel (%p108_p2) target bundleno = 267 (0x10b), region = 36 }
  0xf5   : > { %v659_v15 = vpop.f32.mrb[0].mxu0 }
  0xf6   : > { %v362_v16 = vadd.f32 %v659_v15, %v613_v14  ;;  %v356_v17 = vpop.f32.mrb[1].mxu0 }
  0xf7   : > { %v357_v18 = vadd.f32 %v613_v14, %v356_v17 }
  0xf8   : > { %367 = vst.msk [vmem:[%s976_s25 + $0x8] sm:$0xff] %vm365_vm1, %v362_v16  ;;  %v373_v20 = vsel (!%p108_p2), %vm365_vm1, %v362_v16, 0.0  ;;  %v384_v23 = vmul.f32 (!%p108_p2), %v362_v16, %v362_v16 }
  0xf9   : > { %366 = vst.msk [vmem:[%s976_s25] sm:$0xff] %vm365_vm1, %v357_v18  ;;  %v372_v19 = vsel (!%p108_p2), %vm365_vm1, %v357_v18, 0.0  ;;  %v383_v21 = vmul.f32 (!%p108_p2), %v357_v18, %v357_v18 }
  0xfa   : > { %v374_v22 = vadd.f32 %v373_v20, %v372_v19  ;;  %v386_v26 = vsel %vm365_vm1, %v384_v23, 0.0 }
  0xfb   : > { %v385_v24 = vsel %vm365_vm1, %v383_v21, 0.0 }
  0xfc   : > { %v375_v25 = vrot.slane %v374_v22, 4  ;;  %v387_v27 = vadd.f32 %v386_v26, %v385_v24 }
  0xfe   : > { %v376_v28 = vadd.f32 %v375_v25, %v374_v22  ;;  %v388_v29 = vrot.slane %v387_v27, 4 }
 0x100   : > { %v377_v30 = vrot.slane %v376_v28, 2  ;;  %v389_v31 = vadd.f32 %v388_v29, %v387_v27 }
 0x102   : > { %v378_v32 = vadd.f32 %v377_v30, %v376_v28  ;;  %v390_v33 = vrot.slane %v389_v31, 2 }
 0x104   : > { %v379_v34 = vrot.slane %v378_v32, 1  ;;  %v391_v35 = vadd.f32 %v390_v33, %v389_v31 }
 0x106   : > { %v380_v36 = vadd.f32 %v379_v34, %v378_v32  ;;  %v392_v37 = vrot.slane %v391_v35, 1 }
 0x108   : > { %382 = vst.msk [vmem:[%s983_s26] sm:$0x1] %vm381_vm2, %v380_v36  ;;  %v393_v38 = vadd.f32 %v392_v37, %v391_v35 }
 0x10a   : > { %394 = vst.msk [vmem:[%s986_s30] sm:$0x1] %vm381_vm2, %v393_v38 }
 0x10b PF: > { %p617_p11 = scmp.ne.s32.totalorder %s906_s22, 1 }
 0x10c   : > { %s618_s6 = sshll.u32 (!%p617_p11), %s906_s22, 4  ;;  %v400_v39 = vlaneseq (!%p617_p11)  ;;  %vm423_vm5 = vcmask (!%p617_p11), 253952  }
 0x10d   : > { %398 = sbr.rel (%p617_p11) target bundleno = 296 (0x128), region = 40  ;;  %v403_v40 = vstv (!%p617_p11), %s618_s6 }
 0x10e   : > { %v401_v41 = vshrl.u32 (!%p617_p11), %v400_v39, 7 }
 0x110   : > { %v402_v42 = vadd.s32 (!%p617_p11), 8, %v401_v41  ;;  %v404_v43 = vadd.s32 (!%p617_p11), %v403_v40, %v401_v41 }
 0x112   : > { %v405_v44 = vadd.s32 (!%p617_p11), %v403_v40, %v402_v42  ;;  %vm406_vm3 = vcmp.lt.s32.totalorder (!%p617_p11), %v404_v43, 20 }
 0x113   : > { %v412_v45 = vsel (!%p617_p11), %vm406_vm3, %v357_v18, 0.0 }
 0x114   : > { %vm407_vm4 = vcmp.lt.s32.totalorder %v405_v44, 20  ;;  %v414_v46 = vsel %vm365_vm1, %v412_v45, 0.0  ;;  %v425_v47 = vmul.f32 %v412_v45, %v412_v45 }
 0x115   : > { %v413_v48 = vsel %vm407_vm4, %v362_v16, 0.0 }
 0x116   : > { %v415_v49 = vsel %vm365_vm1, %v413_v48, 0.0  ;;  %v426_v50 = vmul.f32 %v413_v48, %v413_v48  ;;  %v427_v51 = vsel %vm365_vm1, %v425_v47, 0.0 }
 0x117   : > { %v416_v52 = vadd.f32 %v415_v49, %v414_v46 }
 0x118   : > { %v428_v53 = vsel %vm365_vm1, %v426_v50, 0.0 }
 0x119   : > { %v417_v54 = vrot.slane %v416_v52, 4  ;;  %v429_v55 = vadd.f32 %v428_v53, %v427_v51 }
 0x11b   : > { %v418_v56 = vadd.f32 %v417_v54, %v416_v52  ;;  %v430_v57 = vrot.slane %v429_v55, 4 }
 0x11d   : > { %v419_v58 = vrot.slane %v418_v56, 2  ;;  %v431_v59 = vadd.f32 %v430_v57, %v429_v55 }
 0x11f   : > { %v420_v60 = vadd.f32 %v419_v58, %v418_v56  ;;  %v432_v61 = vrot.slane %v431_v59, 2 }
 0x121   : > { %v421_v62 = vrot.slane %v420_v60, 1  ;;  %v433_v63 = vadd.f32 %v432_v61, %v431_v59 }
 0x123   : > { %v422_v0 = vadd.f32 %v421_v62, %v420_v60  ;;  %v434_v1 = vrot.slane %v433_v63, 1 }
 0x125   : > { %424 = vst.msk [vmem:[%s983_s26] sm:$0x1] %vm423_vm5, %v422_v0  ;;  %v435_v2 = vadd.f32 %v434_v1, %v433_v63 }
 0x127   : > { %436 = vst.msk [vmem:[%s986_s30] sm:$0x1] %vm423_vm5, %v435_v2 }
 0x128 PF: > { %s442_s7 = sand.u32 1, %s906_s22   ;;  %s438_s8 = scalar_lea.sflag [#allocation3], %s954_s14 }
 0x129   : > { %s1006_s9 = scalar_lea.sflag [#allocation5], %s442_s7  ;;  %452 = sbr.rel (!%p927_p5) target bundleno = 332 (0x14c), region = 44 }
 0x12a   : > { %s454_s10 = ssub.s32 (%p927_p5), 3, %s947_s11 }
 0x12b   : > { %p455_p12 = scmp.lt.s32.totalorder (%p927_p5), %s454_s10, 2 }
 0x130   : > { %s1132_s10 = smov (!%p455_p12, %s454_s10), 2 }
 0x131   : > { %s1011_s12 = sshll.u32 %s1132_s10, 7 }
 0x132   : > { %s459_s13 = ssub.s32 256, %s1011_s12 }
 0x133   : > { %460 = vsyncadd %s438_s8, %s459_s13  ;;  %p622_p13 = scmp.ne.s32.totalorder %s1011_s12, 0  ;;  %s630_s15 = sshll.u32 %s906_s22, 8 }
 0x134   : > { %s1021_s6 = scalar_lea.hbm %s1120_s3, %s630_s15  ;;  %s465_s11 = sshll.u32 %s976_s25, 4  ;;  %s1024_s11 = int_to_ptr.vmem [resolvable:$true] %s465_s11 }
 0x135   : > { %s726_s7 = scalar_lea.vmem %s1024_s11, %s1011_s12  ;;  %s850_s10 = smov [#allocation2]  }
 0x136   : > { %p727_p0 = scmp.ne.s32.totalorder %s1024_s11, %s726_s7  ;;  %s730_s13 = sshll.u32 %s850_s10, 4  ;;  %s731_s13 = int_to_ptr.vmem [resolvable:$false] %s730_s13 }
 0x137   : > { %s732_s23 = scalar_lea.vmem %s731_s13, 512  ;;  %p733_p3 = scmp.lt.s32.totalorder %s1024_s11, %s731_s13 }
 0x138   : > { %p728_p1 = pnand %p727_p0, %p622_p13  ;;  %p734_p4 = scmp.lt.s32.totalorder %s732_s23, %s726_s7 }
 0x13a   : > { %p729_p2 = pneg %p728_p1  ;;  %p735_p7 = por %p734_p4, %p733_p3 }
 0x13c   : > { %p736_p8 = pnand %p735_p7, %p729_p2 }
 0x13e   : > { %739 = shalt.err (!%p736_p8)
}
 0x13f   : > { %s740_s25 = scalar_lea.hbm %s1021_s6, %s1011_s12  ;;  %s744_s17 = scalar_lea.hbm %s1120_s3, 384 }
 0x140   : > { %p741_p9 = scmp.ne.s32.totalorder %s1021_s6, %s740_s25  ;;  %p745_p12 = scmp.lt.u32.totalorder %s1021_s6, %s1120_s3 }
 0x141   : > { %p746_p0 = scmp.lt.u32.totalorder %s744_s17, %s740_s25  ;;  %p748_p2 = scmp.lt.u32.totalorder %s740_s25, %s1021_s6 }
 0x142   : > { %p742_p10 = pnand %p741_p9, %p622_p13 }
 0x143   : > { %p747_p1 = por %p746_p0, %p745_p12 }
 0x144   : > { %p743_p11 = pneg %p742_p10 }
 0x145   : > { %p749_p3 = por %p748_p2, %p747_p1 }
 0x147   : > { %p750_p4 = pnand %p749_p3, %p743_p11 }
 0x149   : > { %753 = shalt.err (!%p750_p4)
}
 0x14a   : > { %s851_s7 = smov 128   ;;  %s852_s13 = smov 8  }
 0x14b   : > { %471 = dma.vmem_to_hbm [thread:$0]  (%p622_p13), %s1024_s11, %s1011_s12, %s1021_s6, %s438_s8, %s851_s7, %s851_s7, %s852_s13  }
 0x14c PF: > { %s626_s15 = sshll.u32 %s906_s22, 4  ;;  %s481_s25 = sshll.u32 %s983_s26, 4  ;;  %s482_s25 = int_to_ptr.vmem [resolvable:$true] %s481_s25 }
 0x14d   : > { %s479_s10 = scalar_lea.hbm %s1121_s4, %s626_s15  ;;  %s754_s23 = scalar_lea.vmem %s482_s25, 16 }
 0x14e   : > { %p755_p7 = scmp.ne.s32.totalorder %s482_s25, %s754_s23  ;;  %s853_s14 = smov [#allocation4]  }
 0x14f   : > { %s758_s8 = sshll.u32 %s853_s14, 4  ;;  %s759_s8 = int_to_ptr.vmem [resolvable:$false] %s758_s8 }
 0x150   : > { %p756_p8 = pnand %p755_p7, %p927_p5  ;;  %s760_s12 = scalar_lea.vmem %s759_s8, 32 }
 0x151   : > { %p761_p13 = scmp.lt.s32.totalorder %s482_s25, %s759_s8  ;;  %p762_p10 = scmp.lt.s32.totalorder %s760_s12, %s754_s23 }
 0x152   : > { %p757_p9 = pneg %p756_p8 }
 0x153   : > { %p763_p11 = por %p762_p10, %p761_p13 }
 0x155   : > { %p764_p12 = pnand %p763_p11, %p757_p9 }
 0x157   : > { %767 = shalt.err (!%p764_p12)
}
 0x158   : > { %s768_s26 = scalar_lea.hbm %s479_s10, 16  ;;  %s772_s7 = scalar_lea.hbm %s1121_s4, 32 }
 0x159   : > { %p769_p0 = scmp.ne.s32.totalorder %s479_s10, %s768_s26  ;;  %p773_p3 = scmp.lt.u32.totalorder %s479_s10, %s1121_s4 }
 0x15a   : > { %p774_p4 = scmp.lt.u32.totalorder %s772_s7, %s768_s26  ;;  %p776_p8 = scmp.lt.u32.totalorder %s768_s26, %s479_s10 }
 0x15b   : > { %p770_p1 = pnand %p769_p0, %p927_p5 }
 0x15c   : > { %p775_p7 = por %p774_p4, %p773_p3 }
 0x15d   : > { %p771_p2 = pneg %p770_p1 }
 0x15e   : > { %p777_p13 = por %p776_p8, %p775_p7 }
 0x160   : > { %p778_p9 = pnand %p777_p13, %p771_p2 }
 0x162   : > { %781 = shalt.err (!%p778_p9)
}
 0x163   : > { %676 = dma.vmem_to_hbm [thread:$0]  (%p927_p5), %s482_s25, 16, %s479_s10, %s1006_s9  }
 0x164   : > { %s1077_s14 = scalar_lea.hbm %s1122_s5, %s626_s15  ;;  %s494_s8 = sshll.u32 %s986_s30, 4  ;;  %s495_s8 = int_to_ptr.vmem [resolvable:$true] %s494_s8 }
 0x165   : > { %s782_s12 = scalar_lea.vmem %s495_s8, 16  ;;  %s854_s26 = smov [#allocation6]  }
 0x166   : > { %p783_p10 = scmp.ne.s32.totalorder %s495_s8, %s782_s12  ;;  %s786_s6 = sshll.u32 %s854_s26, 4  ;;  %s787_s6 = int_to_ptr.vmem [resolvable:$false] %s786_s6 }
 0x167   : > { %s788_s11 = scalar_lea.vmem %s787_s6, 32  ;;  %p789_p0 = scmp.lt.s32.totalorder %s495_s8, %s787_s6 }
 0x168   : > { %p784_p11 = pnand %p783_p10, %p927_p5  ;;  %p790_p1 = scmp.lt.s32.totalorder %s788_s11, %s782_s12 }
 0x16a   : > { %p785_p12 = pneg %p784_p11  ;;  %p791_p2 = por %p790_p1, %p789_p0 }
 0x16c   : > { %p792_p3 = pnand %p791_p2, %p785_p12 }
 0x16e   : > { %795 = shalt.err (!%p792_p3)
}
 0x16f   : > { %s796_s22 = scalar_lea.hbm %s1077_s14, 16  ;;  %s800_s25 = scalar_lea.hbm %s1122_s5, 32 }
 0x170   : > { %p797_p4 = scmp.ne.s32.totalorder %s1077_s14, %s796_s22  ;;  %p801_p13 = scmp.lt.u32.totalorder %s1077_s14, %s1122_s5 }
 0x171   : > { %p802_p9 = scmp.lt.u32.totalorder %s800_s25, %s796_s22  ;;  %p804_p11 = scmp.lt.u32.totalorder %s796_s22, %s1077_s14 }
 0x172   : > { %p798_p7 = pnand %p797_p4, %p927_p5 }
 0x173   : > { %p803_p10 = por %p802_p9, %p801_p13 }
 0x174   : > { %p799_p8 = pneg %p798_p7 }
 0x175   : > { %p805_p12 = por %p804_p11, %p803_p10 }
 0x177   : > { %p806_p0 = pnand %p805_p12, %p799_p8 }
 0x179   : > { %809 = shalt.err (!%p806_p0)
}
 0x17a   : > { %677 = dma.vmem_to_hbm [thread:$0]  (%p927_p5), %s495_s8, 16, %s1077_s14, %s1006_s9  }
 0x17b PF: > { %p691_p1 = scmp.ge.s32.totalorder %s848_s21, 2  ;;  %s506_s13 = sand.u32 1, %s836_s18  }
 0x17c   : > { %s507_s16 = scalar_lea.sflag [#allocation3], %s506_s13 }
 0x17d   : > { %p682_p2 = pnand %p691_p1, %p931_p6 }
 0x17f   : > { %827 = dma.done.wait (!%p682_p2), %s507_s16, 256  }
 0x180   : > { %829 = vsyncadd (!%p682_p2), %s507_s16, 4294967040  ;;  %s1126_s17 = sadd.s32 4294967294, %s848_s21  }
 0x181   : > { %s515_s23 = sand.u32 1, %s1126_s17  }
 0x182   : > { %s516_s12 = scalar_lea.sflag [#allocation5], %s515_s23 }
 0x183   : > { %831 = dma.done.wait (!%p682_p2), %s516_s12, 32  }
 0x184   : > { %833 = vsyncadd (!%p682_p2), %s516_s12, 4294967264  ;;  %p19_p5 = scmp.ge.s32.totalorder %s910_s24, 4   ;;  %s1127_s18 = smov %s840_s19 }
 0x185   : > { %s1128_s19 = smov %s844_s20  ;;  %s1129_s20 = smov %s923_s27 }
 0x186   : > { %s1130_s21 = smov %s910_s24  ;;  %21 = sbr.rel (!%p19_p5) target bundleno = 5 (0x5), region = 107 }
 0x18d   :  { %528 = vsyncpa [#allocation3], 1 }
 0x18e   :  { %530 = vsyncpa [#allocation3 + $0x1], 1 }
 0x18f   :  { %531 = vsyncpa [#allocation5], 1 }
 0x190   :  { %533 = vsyncpa [#allocation5 + $0x1], 1 }

</bundles_post_ra>
